<compile_context>
chip_gen: v7x
topology: tpu7x:2x2x1
jax: 0.10.0
libtpu: 0.0.40
codegen_flags: <defaults>
</compile_context>

<pallas_src>
import functools

import jax
import jax.numpy as jnp
from jax.experimental import pallas as pl
from jax.experimental.pallas import tpu as pltpu

K_IN = 540      # raw feature width (unpadded; block last dim == full array dim)
H1 = 128        # FL1 / FL2 width
H2 = 64         # FL[0] width
H3 = 8          # FL[2] width
OUT_PAD = 128   # lane-dense padded output width (cols 0,1 hold the 2 probs)

# 128-aligned offsets of each bias inside the packed (1, 640) bias buffer.
_B1_OFF, _B2_OFF, _B3_OFF, _B4_OFF, _B5_OFF = 0, 128, 256, 384, 512
_BIAS_PACK_W = 640


def mlp_kernel(x_ref, x1_ref, w1_ref, w2_ref, w3a_ref, w3b_ref, w4_ref,
               w5s_ref, bias_ref, o_ref):
    # static, 128-aligned lane slices of the packed bias buffer
    b1 = bias_ref[:, _B1_OFF:_B1_OFF + H1]
    b2 = bias_ref[:, _B2_OFF:_B2_OFF + H1]
    b3 = bias_ref[:, _B3_OFF:_B3_OFF + H2]
    b4 = bias_ref[:, _B4_OFF:_B4_OFF + H3]
    b5s = bias_ref[:, _B5_OFF:_B5_OFF + OUT_PAD]

    # branch 1/2: relu(FLi(.))   (tile, 540) @ (540, 128) -> (tile, 128)
    h1 = jnp.dot(x_ref[...], w1_ref[...], preferred_element_type=jnp.float32)
    h1 = jnp.maximum(h1 + b1, 0.0)
    h2 = jnp.dot(x1_ref[...], w2_ref[...], preferred_element_type=jnp.float32)
    h2 = jnp.maximum(h2 + b2, 0.0)

    # concat((h1, h2), -1) @ w3  ==  h1 @ w3[:128] + h2 @ w3[128:]  (no lane concat)
    z = (jnp.dot(h1, w3a_ref[...], preferred_element_type=jnp.float32)
         + jnp.dot(h2, w3b_ref[...], preferred_element_type=jnp.float32) + b3)
    z = jnp.maximum(z, 0.0)                                            # (tile, 64)

    z = jnp.dot(z, w4_ref[...], preferred_element_type=jnp.float32)
    z = jnp.maximum(z + b4, 0.0)                                       # (tile, 8)

    # 2-class softmax as sigmoid of logit differences.  w5s/b5s columns 0 and 1
    # hold (l0 - l1) and (l1 - l0) projections; the 126 zero-padded columns give
    # sigmoid(0)=0.5 and are sliced away in the wrapper.  Store stays lane-dense.
    d = jnp.dot(z, w5s_ref[...], preferred_element_type=jnp.float32) + b5s
    o_ref[...] = jax.nn.sigmoid(d)                                     # (tile, 128)


def prepare_params(params):
    """One-time weight prep (split / fold / bias-pack).  Call OUTSIDE the hot path."""
    (w1, b1, w2, b2, w3, b3, w4, b4, w5, b5) = params
    f32 = jnp.float32
    w1p = jnp.asarray(w1, f32)           # (540, 128)
    w2p = jnp.asarray(w2, f32)           # (540, 128)
    w3a = jnp.asarray(w3[:H1], f32)      # (128, 64)
    w3b = jnp.asarray(w3[H1:], f32)      # (128, 64)
    w4p = jnp.asarray(w4, f32)           # (64, 8)

    # Fold Linear(8,2) + softmax(dim=0) into sigmoid of logit differences.
    d_w = (w5[:, 0] - w5[:, 1]).astype(f32)
    d_b = (b5[0] - b5[1]).astype(f32)
    w5s = jnp.zeros((H3, OUT_PAD), f32).at[:, 0].set(d_w).at[:, 1].set(-d_w)

    bias = jnp.zeros((1, _BIAS_PACK_W), f32)
    bias = bias.at[0, _B1_OFF:_B1_OFF + H1].set(b1.astype(f32))
    bias = bias.at[0, _B2_OFF:_B2_OFF + H1].set(b2.astype(f32))
    bias = bias.at[0, _B3_OFF:_B3_OFF + H2].set(b3.astype(f32))
    bias = bias.at[0, _B4_OFF:_B4_OFF + H3].set(b4.astype(f32))
    bias = bias.at[0, _B5_OFF].set(d_b)
    bias = bias.at[0, _B5_OFF + 1].set(-d_b)
    return (w1p, w2p, w3a, w3b, w4p, w5s, bias)


def _round_up(a, m):
    return -(-a // m) * m


def _pick_tile_m(b):
    if b <= 8:
        return 8
    # >= 2 grid steps so the "parallel" batch axis shards across both v7x TCs;
    # cap at 1024 rows: ~13 MiB f32 footprint, safe under the 32 MiB scoped VMEM
    # we request below on every generation (v5e/v6e/v7x).
    return min(1024, _round_up(_round_up(b, 2) // 2, 8))


@functools.partial(jax.jit, static_argnames=("tile_m",))
def mlpnet_forward(x, x1, prepped, *, tile_m=None):
    """x, x1: (540,) or (B, 540).  prepped = prepare_params(params).
    Returns (2,) or (B, 2) softmax probabilities."""
    squeeze = x.ndim == 1
    X = jnp.atleast_2d(x)
    X1 = jnp.atleast_2d(x1)
    # Stream bf16 as-is (halves HBM read traffic); anything else goes to f32.
    if X.dtype not in (jnp.float32, jnp.bfloat16):
        X = X.astype(jnp.float32)
        X1 = X1.astype(jnp.float32)

    B, K = X.shape
    assert K == K_IN and X1.shape == (B, K_IN)

    # Only micro-batches (< one sublane) get padded; everything else runs
    # unpadded with a cdiv grid and a masked partial last tile.
    if B < 8:
        pad = 8 - B
        X = jnp.concatenate([X, jnp.zeros((pad, K_IN), X.dtype)], axis=0)
        X1 = jnp.concatenate([X1, jnp.zeros((pad, K_IN), X1.dtype)], axis=0)
        Bp = 8
    else:
        Bp = B

    if tile_m is None:
        tile_m = _pick_tile_m(Bp)
    grid = pl.cdiv(Bp, tile_m)

    w1p, w2p, w3a, w3b, w4p, w5s, bias = prepped

    def const_spec(shape):
        # same block every grid step -> DMA'd once, stays VMEM-resident
        return pl.BlockSpec(shape, lambda i: (0, 0))

    out = pl.pallas_call(
        mlp_kernel,
        out_shape=jax.ShapeDtypeStruct((Bp, OUT_PAD), jnp.float32),
        grid_spec=pltpu.PrefetchScalarGridSpec(
            num_scalar_prefetch=0,
            grid=(grid,),
            in_specs=[
                pl.BlockSpec((tile_m, K_IN), lambda i: (i, 0)),   # x tile
                pl.BlockSpec((tile_m, K_IN), lambda i: (i, 0)),   # x1 tile
                const_spec(w1p.shape),
                const_spec(w2p.shape),
                const_spec(w3a.shape),
                const_spec(w3b.shape),
                const_spec(w4p.shape),
                const_spec(w5s.shape),
                const_spec(bias.shape),
            ],
            out_specs=pl.BlockSpec((tile_m, OUT_PAD), lambda i: (i, 0)),
        ),
        compiler_params=pltpu.CompilerParams(
            dimension_semantics=("parallel",),
            vmem_limit_bytes=32 * 1024 * 1024),
    )(X, X1, w1p, w2p, w3a, w3b, w4p, w5s, bias)

    probs = out[:B, :2]
    return probs[0] if squeeze else probs


def init_params(key):
    """Deterministic init mimicking torch.nn.Linear default: U(-1/sqrt(fan_in), +)."""
    def linear(key, fan_in, fan_out):
        kw, kb = jax.random.split(key)
        bound = 1.0 / jnp.sqrt(fan_in)
        # stored as (in, out) so each layer is y = x @ W + b
        w = jax.random.uniform(kw, (fan_in, fan_out), jnp.float32, -bound, bound)
        b = jax.random.uniform(kb, (fan_out,), jnp.float32, -bound, bound)
        return w, b

    k1, k2, k3, k4, k5 = jax.random.split(key, 5)
    w1, b1 = linear(k1, 540, 128)   # FL1
    w2, b2 = linear(k2, 540, 128)   # FL2
    w3, b3 = linear(k3, 256, 64)    # FL[0]
    w4, b4 = linear(k4, 64, 8)      # FL[2]
    w5, b5 = linear(k5, 8, 2)       # FL[4]
    return (w1, b1, w2, b2, w3, b3, w4, b4, w5, b5)


def reference_forward(x, x1, params):
    """Faithful per-sample re-implementation of the PyTorch module (f32)."""
    (w1, b1, w2, b2, w3, b3, w4, b4, w5, b5) = params
    hi = jax.lax.Precision.HIGHEST
    h1 = jnp.maximum(jnp.dot(x, w1, precision=hi) + b1, 0.0)
    h2 = jnp.maximum(jnp.dot(x1, w2, precision=hi) + b2, 0.0)
    h = jnp.concatenate([h1, h2], axis=0)               # torch.concat dim 0 on 1-D
    z = jnp.maximum(jnp.dot(h, w3, precision=hi) + b3, 0.0)
    z = jnp.maximum(jnp.dot(z, w4, precision=hi) + b4, 0.0)
    logits = jnp.dot(z, w5, precision=hi) + b5
    return jax.nn.softmax(logits, axis=0)                # torch.softmax dim 0 on 1-D


if __name__ == "__main__":
    key = jax.random.PRNGKey(0)
    kx, kx1, kp = jax.random.split(key, 3)

    B = 16
    X = jax.random.normal(kx, (B, K_IN), jnp.float32)
    X1 = jax.random.normal(kx1, (B, K_IN), jnp.float32)
    params = init_params(kp)
    prepped = prepare_params(params)   # one-time weight prep (hoisted out of hot path)

    # Batched path: tile_m auto-picks 8 -> 2 grid steps (weight residency + 2 TCs).
    out = jax.block_until_ready(mlpnet_forward(X, X1, prepped))
    ref = jax.vmap(reference_forward, in_axes=(0, 0, None))(X, X1, params)
    assert out.shape == (B, 2)
    assert jnp.allclose(out, ref, atol=1e-4, rtol=1e-4), (out, ref)
    assert jnp.allclose(out.sum(axis=-1), 1.0, atol=1e-5)

    # Ragged batch (13 rows, tile_m=8): exercises the cdiv grid / masked partial tile.
    Br = 13
    out_r = jax.block_until_ready(mlpnet_forward(X[:Br], X1[:Br], prepped))
    assert out_r.shape == (Br, 2)
    assert jnp.allclose(out_r, ref[:Br], atol=1e-4, rtol=1e-4), (out_r, ref[:Br])

    # Original single-sample (540,) path of the torch module.
    out1 = jax.block_until_ready(mlpnet_forward(X[0], X1[0], prepped))
    ref1 = reference_forward(X[0], X1[0], params)
    assert out1.shape == (2,)
    assert jnp.allclose(out1, ref1, atol=1e-4, rtol=1e-4), (out1, ref1)

    print("KERNEL_OK")
</pallas_src>

<mosaic_0001>
module attributes {stable_mosaic.version = 11 : i64} {
  func.func @mlp_kernel(%arg0: i32, %arg1: memref<8x540xf32, #tpu.memory_space<vmem>>, %arg2: memref<8x540xf32, #tpu.memory_space<vmem>>, %arg3: memref<540x128xf32, #tpu.memory_space<vmem>>, %arg4: memref<540x128xf32, #tpu.memory_space<vmem>>, %arg5: memref<128x64xf32, #tpu.memory_space<vmem>>, %arg6: memref<128x64xf32, #tpu.memory_space<vmem>>, %arg7: memref<64x8xf32, #tpu.memory_space<vmem>>, %arg8: memref<8x128xf32, #tpu.memory_space<vmem>>, %arg9: memref<1x640xf32, #tpu.memory_space<vmem>>, %arg10: memref<8x128xf32, #tpu.memory_space<vmem>>) attributes {dimension_semantics = [#tpu.dimension_semantics<parallel>], iteration_bounds = array<i64: 2>, scalar_prefetch = 0 : i64, scratch_operands = 0 : i64, tpu.core_type = #tpu.core_type<tc>, window_params = [{transform_indices = @transform_0, window_bounds = array<i64: 8, 540>}, {transform_indices = @transform_1, window_bounds = array<i64: 8, 540>}, {pipeline_mode = #tpu.pipeline_mode<synchronous>, transform_indices = @transform_2, window_bounds = array<i64: 540, 128>}, {pipeline_mode = #tpu.pipeline_mode<synchronous>, transform_indices = @transform_3, window_bounds = array<i64: 540, 128>}, {pipeline_mode = #tpu.pipeline_mode<synchronous>, transform_indices = @transform_4, window_bounds = array<i64: 128, 64>}, {pipeline_mode = #tpu.pipeline_mode<synchronous>, transform_indices = @transform_5, window_bounds = array<i64: 128, 64>}, {pipeline_mode = #tpu.pipeline_mode<synchronous>, transform_indices = @transform_6, window_bounds = array<i64: 64, 8>}, {pipeline_mode = #tpu.pipeline_mode<synchronous>, transform_indices = @transform_7, window_bounds = array<i64: 8, 128>}, {pipeline_mode = #tpu.pipeline_mode<synchronous>, transform_indices = @transform_8, window_bounds = array<i64: 1, 640>}, {transform_indices = @transform_9, window_bounds = array<i64: 8, 128>}]} {
    %c0 = arith.constant 0 : index
    %c0_0 = arith.constant 0 : index
    %0 = vector.load %arg9[%c0, %c0_0] : memref<1x640xf32, #tpu.memory_space<vmem>>, vector<1x128xf32>
    %c0_1 = arith.constant 0 : index
    %c128 = arith.constant 128 : index
    %1 = vector.load %arg9[%c0_1, %c128] : memref<1x640xf32, #tpu.memory_space<vmem>>, vector<1x128xf32>
    %c0_2 = arith.constant 0 : index
    %c256 = arith.constant 256 : index
    %2 = vector.load %arg9[%c0_2, %c256] : memref<1x640xf32, #tpu.memory_space<vmem>>, vector<1x64xf32>
    %c0_3 = arith.constant 0 : index
    %c384 = arith.constant 384 : index
    %3 = vector.load %arg9[%c0_3, %c384] : memref<1x640xf32, #tpu.memory_space<vmem>>, vector<1x8xf32>
    %c0_4 = arith.constant 0 : index
    %c512 = arith.constant 512 : index
    %4 = vector.load %arg9[%c0_4, %c512] : memref<1x640xf32, #tpu.memory_space<vmem>>, vector<1x128xf32>
    %c0_5 = arith.constant 0 : index
    %c0_6 = arith.constant 0 : index
    %5 = vector.load %arg1[%c0_5, %c0_6] : memref<8x540xf32, #tpu.memory_space<vmem>>, vector<8x540xf32>
    %c0_7 = arith.constant 0 : index
    %c0_8 = arith.constant 0 : index
    %6 = vector.load %arg3[%c0_7, %c0_8] : memref<540x128xf32, #tpu.memory_space<vmem>>, vector<540x128xf32>
    %cst = arith.constant dense<0.000000e+00> : vector<8x128xf32>
    %7 = tpu.matmul %5, %6, %cst {dimension_numbers = #tpu.dot_dimension_numbers<[1], [0], [0], [1], [0, 0, 1, 1], [], []>} : vector<8x540xf32>, vector<540x128xf32>, vector<8x128xf32> -> vector<8x128xf32>
    %8 = vector.broadcast %0 : vector<1x128xf32> to vector<8x128xf32>
    %9 = arith.addf %7, %8 : vector<8x128xf32>
    %cst_9 = arith.constant 0.000000e+00 : f32
    %10 = vector.broadcast %cst_9 : f32 to vector<8x128xf32>
    %11 = arith.maximumf %9, %10 : vector<8x128xf32>
    %c0_10 = arith.constant 0 : index
    %c0_11 = arith.constant 0 : index
    %12 = vector.load %arg2[%c0_10, %c0_11] : memref<8x540xf32, #tpu.memory_space<vmem>>, vector<8x540xf32>
    %c0_12 = arith.constant 0 : index
    %c0_13 = arith.constant 0 : index
    %13 = vector.load %arg4[%c0_12, %c0_13] : memref<540x128xf32, #tpu.memory_space<vmem>>, vector<540x128xf32>
    %cst_14 = arith.constant dense<0.000000e+00> : vector<8x128xf32>
    %14 = tpu.matmul %12, %13, %cst_14 {dimension_numbers = #tpu.dot_dimension_numbers<[1], [0], [0], [1], [0, 0, 1, 1], [], []>} : vector<8x540xf32>, vector<540x128xf32>, vector<8x128xf32> -> vector<8x128xf32>
    %15 = vector.broadcast %1 : vector<1x128xf32> to vector<8x128xf32>
    %16 = arith.addf %14, %15 : vector<8x128xf32>
    %cst_15 = arith.constant 0.000000e+00 : f32
    %17 = vector.broadcast %cst_15 : f32 to vector<8x128xf32>
    %18 = arith.maximumf %16, %17 : vector<8x128xf32>
    %c0_16 = arith.constant 0 : index
    %c0_17 = arith.constant 0 : index
    %19 = vector.load %arg5[%c0_16, %c0_17] : memref<128x64xf32, #tpu.memory_space<vmem>>, vector<128x64xf32>
    %cst_18 = arith.constant dense<0.000000e+00> : vector<8x64xf32>
    %20 = tpu.matmul %11, %19, %cst_18 {dimension_numbers = #tpu.dot_dimension_numbers<[1], [0], [0], [1], [0, 0, 1, 1], [], []>} : vector<8x128xf32>, vector<128x64xf32>, vector<8x64xf32> -> vector<8x64xf32>
    %c0_19 = arith.constant 0 : index
    %c0_20 = arith.constant 0 : index
    %21 = vector.load %arg6[%c0_19, %c0_20] : memref<128x64xf32, #tpu.memory_space<vmem>>, vector<128x64xf32>
    %cst_21 = arith.constant dense<0.000000e+00> : vector<8x64xf32>
    %22 = tpu.matmul %18, %21, %cst_21 {dimension_numbers = #tpu.dot_dimension_numbers<[1], [0], [0], [1], [0, 0, 1, 1], [], []>} : vector<8x128xf32>, vector<128x64xf32>, vector<8x64xf32> -> vector<8x64xf32>
    %23 = arith.addf %20, %22 : vector<8x64xf32>
    %24 = vector.broadcast %2 : vector<1x64xf32> to vector<8x64xf32>
    %25 = arith.addf %23, %24 : vector<8x64xf32>
    %cst_22 = arith.constant 0.000000e+00 : f32
    %26 = vector.broadcast %cst_22 : f32 to vector<8x64xf32>
    %27 = arith.maximumf %25, %26 : vector<8x64xf32>
    %c0_23 = arith.constant 0 : index
    %c0_24 = arith.constant 0 : index
    %28 = vector.load %arg7[%c0_23, %c0_24] : memref<64x8xf32, #tpu.memory_space<vmem>>, vector<64x8xf32>
    %cst_25 = arith.constant dense<0.000000e+00> : vector<8x8xf32>
    %29 = tpu.matmul %27, %28, %cst_25 {dimension_numbers = #tpu.dot_dimension_numbers<[1], [0], [0], [1], [0, 0, 1, 1], [], []>} : vector<8x64xf32>, vector<64x8xf32>, vector<8x8xf32> -> vector<8x8xf32>
    %30 = vector.broadcast %3 : vector<1x8xf32> to vector<8x8xf32>
    %31 = arith.addf %29, %30 : vector<8x8xf32>
    %cst_26 = arith.constant 0.000000e+00 : f32
    %32 = vector.broadcast %cst_26 : f32 to vector<8x8xf32>
    %33 = arith.maximumf %31, %32 : vector<8x8xf32>
    %c0_27 = arith.constant 0 : index
    %c0_28 = arith.constant 0 : index
    %34 = vector.load %arg8[%c0_27, %c0_28] : memref<8x128xf32, #tpu.memory_space<vmem>>, vector<8x128xf32>
    %cst_29 = arith.constant dense<0.000000e+00> : vector<8x128xf32>
    %35 = tpu.matmul %33, %34, %cst_29 {dimension_numbers = #tpu.dot_dimension_numbers<[1], [0], [0], [1], [0, 0, 1, 1], [], []>} : vector<8x8xf32>, vector<8x128xf32>, vector<8x128xf32> -> vector<8x128xf32>
    %36 = vector.broadcast %4 : vector<1x128xf32> to vector<8x128xf32>
    %37 = arith.addf %35, %36 : vector<8x128xf32>
    %38 = arith.negf %37 : vector<8x128xf32>
    %39 = math.exp %38 : vector<8x128xf32>
    %cst_30 = arith.constant 1.000000e+00 : f32
    %40 = vector.broadcast %cst_30 : f32 to vector<8x128xf32>
    %41 = arith.addf %40, %39 : vector<8x128xf32>
    %42 = arith.divf %40, %41 : vector<8x128xf32>
    %c0_31 = arith.constant 0 : index
    %c0_32 = arith.constant 0 : index
    %43 = vector.load %arg10[%c0_31, %c0_32] : memref<8x128xf32, #tpu.memory_space<vmem>>, vector<8x128xf32>
    tpu.vector_store %arg10[%c0_31, %c0_32], %42 {strides = array<i32>} : memref<8x128xf32, #tpu.memory_space<vmem>>, vector<8x128xf32>,
    return
  }
  func.func @transform_0(%arg0: i32) -> (i32, i32) {
    %c0_i32 = arith.constant 0 : i32
    %c0_i32_0 = arith.constant 0 : i32
    return %arg0, %c0_i32 : i32, i32
  }
  func.func @transform_1(%arg0: i32) -> (i32, i32) {
    %c0_i32 = arith.constant 0 : i32
    %c0_i32_0 = arith.constant 0 : i32
    return %arg0, %c0_i32 : i32, i32
  }
  func.func @transform_2(%arg0: i32) -> (i32, i32) {
    %c0_i32 = arith.constant 0 : i32
    %c0_i32_0 = arith.constant 0 : i32
    %c0_i32_1 = arith.constant 0 : i32
    return %c0_i32, %c0_i32_0 : i32, i32
  }
  func.func @transform_3(%arg0: i32) -> (i32, i32) {
    %c0_i32 = arith.constant 0 : i32
    %c0_i32_0 = arith.constant 0 : i32
    %c0_i32_1 = arith.constant 0 : i32
    return %c0_i32, %c0_i32_0 : i32, i32
  }
  func.func @transform_4(%arg0: i32) -> (i32, i32) {
    %c0_i32 = arith.constant 0 : i32
    %c0_i32_0 = arith.constant 0 : i32
    %c0_i32_1 = arith.constant 0 : i32
    return %c0_i32, %c0_i32_0 : i32, i32
  }
  func.func @transform_5(%arg0: i32) -> (i32, i32) {
    %c0_i32 = arith.constant 0 : i32
    %c0_i32_0 = arith.constant 0 : i32
    %c0_i32_1 = arith.constant 0 : i32
    return %c0_i32, %c0_i32_0 : i32, i32
  }
  func.func @transform_6(%arg0: i32) -> (i32, i32) {
    %c0_i32 = arith.constant 0 : i32
    %c0_i32_0 = arith.constant 0 : i32
    %c0_i32_1 = arith.constant 0 : i32
    return %c0_i32, %c0_i32_0 : i32, i32
  }
  func.func @transform_7(%arg0: i32) -> (i32, i32) {
    %c0_i32 = arith.constant 0 : i32
    %c0_i32_0 = arith.constant 0 : i32
    %c0_i32_1 = arith.constant 0 : i32
    return %c0_i32, %c0_i32_0 : i32, i32
  }
  func.func @transform_8(%arg0: i32) -> (i32, i32) {
    %c0_i32 = arith.constant 0 : i32
    %c0_i32_0 = arith.constant 0 : i32
    %c0_i32_1 = arith.constant 0 : i32
    return %c0_i32, %c0_i32_0 : i32, i32
  }
  func.func @transform_9(%arg0: i32) -> (i32, i32) {
    %c0_i32 = arith.constant 0 : i32
    %c0_i32_0 = arith.constant 0 : i32
    return %arg0, %c0_i32 : i32, i32
  }
}

</mosaic_0001>

<bundles_post_ra>
// kernel: mlpnet_forward.1
= control target key start
LH: loop header
LB: loop body
LE: loop exit
PB: predicated region body
PF: predicated region fallthrough
CT: control target
= control target key end

     0   :  { %14 = vsyncpa [#allocation3], 0  ;;  %s2439_s0 = inlined_call_operand.vmem [shape: f32[16,540], index: 0, kind: input, shape index: {}]   ;;  %s2440_s1 = inlined_call_operand.vmem [shape: f32[16,540], index: 1, kind: input, shape index: {}]   ;;  %s2441_s2 = inlined_call_operand.hbm [shape: f32[540,128], index: 2, kind: input, shape index: {}]   ;;  %s2442_s3 = inlined_call_operand.hbm [shape: f32[540,128], index: 3, kind: input, shape index: {}]   ;;  %s2443_s4 = inlined_call_operand.vmem [shape: f32[128,64], index: 4, kind: input, shape index: {}]   ;;  %s2444_s5 = inlined_call_operand.vmem [shape: f32[128,64], index: 5, kind: input, shape index: {}]   ;;  %s2445_s6 = inlined_call_operand.vmem [shape: f32[64,8], index: 6, kind: input, shape index: {}]   ;;  %s2446_s7 = inlined_call_operand.vmem [shape: f32[8,128], index: 7, kind: input, shape index: {}]   ;;  %s2447_s8 = inlined_call_operand.vmem [shape: f32[1,640], index: 8, kind: input, shape index: {}]   ;;  %s2448_s9 = inlined_call_operand.vmem [shape: f32[16,128], index: 9, kind: output, shape index: {}]  }
   0x1   :  { %15 = vsyncpa [#allocation5], 0  ;;  %s2133_s30 = smov 0  }
   0x2 LB: > { %s2139_s10 = sadd.s32 4294967295, %s2073_s30   ;;  %p1426_p0 = scmp.ge.s32.totalorder %s2073_s30, 1  ;;  %s2073_s30 = sphi %s2133_s30, %s21_s30  }
   0x3   : > { %p251_p1 = scmp.lt.s32.totalorder %s2073_s30, 3  ;;  %s2075_s11 = smov [#allocation2]  }
   0x4   : > { %s263_s12 = sshll.u32 %s2075_s11, 4  ;;  %p2449_p3 = scmp.eq.s32.totalorder %s2139_s10, 0  ;;  %s264_s12 = int_to_ptr.vmem [resolvable:$true] %s263_s12 }
   0x5   : > { %p2143_p2 = pnand %p1426_p0, %p251_p1  ;;  %s2076_s14 = smov [#allocation4]  }
   0x6   : > { %s276_s15 = sshll.u32 %s2076_s14, 4  ;;  %s2003_s19 = scalar_lea.hbm %s2441_s2, 8704  ;;  %s2156_s15 = int_to_ptr.vmem [resolvable:$true] %s276_s15 }
   0x7   : > { %s2451_s13 = scalar_select %p2143_p2, 1, 0 }
   0x8   : > { %p1972_p4 = pneg %p2143_p2  ;;  %p2004_p6 = scmp.ne.s32.totalorder %s2441_s2, %s2003_s19 }
   0x9   : > { %p2010_p10 = scmp.lt.u32.totalorder %s2003_s19, %s2441_s2 }
   0xa   : > { %p2152_p5 = pnand %p2449_p3, %p1972_p4 }
   0xc   : > { %p2005_p7 = pneg %p2152_p5 }
   0xe   : > { %p2006_p8 = pnand %p2005_p7, %p2004_p6 }
  0x10   : > { %p2007_p9 = pneg %p2006_p8 }
  0x12   : > { %p2012_p11 = pnand %p2010_p10, %p2007_p9 }
  0x14   : > { %2015 = shalt.err (!%p2012_p11)
}
  0x15   : > { %s2016_s24 = scalar_lea.vmem %s264_s12, 8704  ;;  %p2024_p1 = scmp.lt.s32.totalorder %s264_s12, %s264_s12 }
  0x16   : > { %p2017_p12 = scmp.ne.s32.totalorder %s264_s12, %s2016_s24  ;;  %p2025_p4 = scmp.lt.s32.totalorder %s2016_s24, %s2016_s24 }
  0x18   : > { %p2019_p13 = pnand %p2017_p12, %p2005_p7  ;;  %p2026_p3 = por %p2025_p4, %p2024_p1 }
  0x1a   : > { %p2020_p0 = pneg %p2019_p13 }
  0x1c   : > { %p2027_p2 = pnand %p2026_p3, %p2020_p0 }
  0x1e   : > { %2030 = shalt.err (!%p2027_p2)
}
  0x1f   : > { %s2077_s25 = smov 128   ;;  %s2078_s26 = smov 8  }
  0x20   : > { %1975 = dma.hbm_to_vmem [thread:$0]  (!%p2152_p5), %s2441_s2, 8704, %s264_s12, [#allocation3], %s2077_s25, %s2077_s25, %s2078_s26  }
  0x21   : > { %s2031_s14 = scalar_lea.hbm %s2442_s3, 8704 }
  0x22   : > { %p2032_p6 = scmp.ne.s32.totalorder %s2442_s3, %s2031_s14  ;;  %p2038_p8 = scmp.lt.u32.totalorder %s2031_s14, %s2442_s3 }
  0x24   : > { %p2034_p2 = pnand %p2032_p6, %p2005_p7 }
  0x26   : > { %p2035_p3 = pneg %p2034_p2 }
  0x28   : > { %p2040_p9 = pnand %p2038_p8, %p2035_p3 }
  0x2a   : > { %2043 = shalt.err (!%p2040_p9)
}
  0x2b   : > { %s2044_s12 = scalar_lea.vmem %s2156_s15, 8704  ;;  %p2052_p13 = scmp.lt.s32.totalorder %s2156_s15, %s2156_s15 }
  0x2c   : > { %p2045_p10 = scmp.ne.s32.totalorder %s2156_s15, %s2044_s12  ;;  %p2053_p0 = scmp.lt.s32.totalorder %s2044_s12, %s2044_s12 }
  0x2e   : > { %p2047_p11 = pnand %p2045_p10, %p2005_p7  ;;  %p2054_p1 = por %p2053_p0, %p2052_p13 }
  0x30   : > { %p2048_p12 = pneg %p2047_p11 }
  0x32   : > { %p2055_p4 = pnand %p2054_p1, %p2048_p12 }
  0x34   : > { %2058 = shalt.err (!%p2055_p4)
}
  0x35   : > { %1978 = dma.hbm_to_vmem [thread:$0]  (!%p2152_p5), %s2442_s3, 8704, %s2156_s15, [#allocation5], %s2077_s25, %s2077_s25, %s2078_s26  }
  0x36   : > { %p2453_p6 = scmp.ne.s32.totalorder %s2451_s13, 0 }
  0x37   : > { %p2454_p2 = scmp.eq.s32.totalorder (!%p2453_p6), %s2139_s10, 0 }
  0x38   : > { %323 = sbr.rel (%p2453_p6) target bundleno = 1043 (0x413), region = 56 }
  0x3f   : > { %2064 = dma.done.wait (%p2454_p2), [#allocation3], 8704   ;;  %p2455_p7 = pmov %p2454_p2 }
  0x40   : > { %p2456_p3 = pmov %p2454_p2 }
  0x41   : > { %2066 = vsyncadd (%p2455_p7), [#allocation3], 4294958592 }
  0x42   : > { %2068 = dma.done.wait (%p2456_p3), [#allocation5], 8704   ;;  %p2457_p8 = pmov %p2454_p2 }
  0x43   : > { %v407_v0 = vld [vmem:[#allocation2 + $0x80] sm:$0xff]  ;;  %v408_v1 = vld [vmem:[#allocation2 + $0x88] sm:$0xff]  ;;  %v409_v11 = vld [vmem:[#allocation2 + $0x90] sm:$0xff]  ;;  %p367_p5 = scmp.lt.s32.totalorder %s2139_s10, 1  ;;  %vm469_vm0 = vcmask 1043456   ;;  %vm2080_vm1 = vmmov 1  }
  0x44   : > { %2070 = vsyncadd (%p2457_p8), [#allocation5], 4294958592  ;;  %v439_v2 = vld [vmem:[#allocation2 + $0x180] sm:$0xff]  ;;  %v1761_v3 = vpack.c.bf16 %v408_v1, %v407_v0  ;;  %v440_v4 = vld [vmem:[#allocation2 + $0x188] sm:$0xff]  ;;  %vm2081_vm3 = vmmov 0   ;;  %vm465_vm4 = vcmask 228352  }
  0x45   : > { %v391_v5 = vld [vmem:[#allocation2] sm:$0xff]  ;;  %v392_v6 = vld [vmem:[#allocation2 + $0x8] sm:$0xff]  ;;  %v1793_v7 = vpack.c.bf16 %v440_v4, %v439_v2  ;;  %v410_v13 = vld [vmem:[#allocation2 + $0x98] sm:$0xff]  ;;  %s2461_s10 = smov (!%p367_p5, %s2139_s10), 1  ;;  %vm1174_vm5 = vcmask 523264   ;;  %vm1256_vm6 = vcmask 64512  }
  0x46   : > { %v1763_v8 = vpack.c.bf16 %v392_v6, %v391_v5  ;;  %v423_v9 = vld [vmem:[#allocation2 + $0x100] sm:$0xff]  ;;  %v424_v10 = vld [vmem:[#allocation2 + $0x108] sm:$0xff]  ;;  %1762 = vmatprep.subr.bf16.mxu0 %v1761_v3  ;;  %v441_v14 = vld [vmem:[#allocation2 + $0x190] sm:$0xff]  ;;  %v1765_v16 = vpack.c.bf16 %v410_v13, %v409_v11  ;;  %s1963_s13 = smul.u32 40, %s2461_s10  ;;  %s1435_s24 = sshll.u32 %s2461_s10, 3 }
  0x47   : > { %v1795_v12 = vpack.c.bf16 %v424_v10, %v423_v9  ;;  %v442_v15 = vld [vmem:[#allocation2 + $0x198] sm:$0xff]  ;;  %1794 = vmatprep.subr.bf16.mxu1 %v1793_v7  ;;  %v393_v18 = vld [vmem:[#allocation2 + $0x10] sm:$0xff]  ;;  %v411_v23 = vld [vmem:[#allocation2 + $0xa0] sm:$0xff]  ;;  %s380_s27 = scalar_lea.vmem %s2448_s9, %s1435_s24 }
  0x48   : > { %1764 = vmatpush3.bf16.msra.mxu0 %v1763_v8  ;;  %v1797_v17 = vpack.c.bf16 %v442_v15, %v441_v14  ;;  %v394_v19 = vld [vmem:[#allocation2 + $0x18] sm:$0xff]  ;;  %v425_v20 = vld [vmem:[#allocation2 + $0x110] sm:$0xff]  ;;  %v412_v24 = vld [vmem:[#allocation2 + $0xa8] sm:$0xff]  ;;  %s2227_s23 = scalar_lea.vmem %s2439_s0, %s1963_s13  ;;  %s2250_s26 = scalar_lea.vmem %s2440_s1, %s1963_s13 }
  0x49   : > { %1796 = vmatpush3.bf16.msra.mxu1 %v1795_v12  ;;  %v1767_v21 = vpack.c.bf16 %v394_v19, %v393_v18  ;;  %v426_v22 = vld [vmem:[#allocation2 + $0x118] sm:$0xff]  ;;  %1766 = vmatprep.subr.bf16.mxu0 %v1765_v16  ;;  %v1769_v26 = vpack.c.bf16 %v412_v24, %v411_v23  ;;  %v443_v27 = vld [vmem:[#allocation2 + $0x1a0] sm:$0xff]  ;;  %v444_v28 = vld [vmem:[#allocation2 + $0x1a8] sm:$0xff] }
  0x4a   : > { %1798 = vmatprep.subr.bf16.mxu1 %v1797_v17  ;;  %v1799_v25 = vpack.c.bf16 %v426_v22, %v425_v20  ;;  %v395_v29 = vld [vmem:[#allocation2 + $0x20] sm:$0xff]  ;;  %v1801_v30 = vpack.c.bf16 %v444_v28, %v443_v27  ;;  %v396_v31 = vld [vmem:[#allocation2 + $0x28] sm:$0xff]  ;;  %v413_v35 = vld [vmem:[#allocation2 + $0xb0] sm:$0xff] }
  0x4b   : > { %v427_v32 = vld [vmem:[#allocation2 + $0x120] sm:$0xff]  ;;  %v428_v33 = vld [vmem:[#allocation2 + $0x128] sm:$0xff]  ;;  %v1771_v34 = vpack.c.bf16 %v396_v31, %v395_v29  ;;  %v414_v36 = vld [vmem:[#allocation2 + $0xb8] sm:$0xff] }
  0x4c   : > { %1768 = vmatpush3.bf16.msra.mxu0 %v1767_v21  ;;  %v445_v37 = vld [vmem:[#allocation2 + $0x1b0] sm:$0xff]  ;;  %v1803_v38 = vpack.c.bf16 %v428_v33, %v427_v32  ;;  %v1773_v39 = vpack.c.bf16 %v414_v36, %v413_v35  ;;  %v446_v40 = vld [vmem:[#allocation2 + $0x1b8] sm:$0xff]  ;;  %v415_v46 = vld [vmem:[#allocation2 + $0xc0] sm:$0xff] }
  0x4d   : > { %1800 = vmatpush3.bf16.msra.mxu1 %v1799_v25  ;;  %1770 = vmatprep.subr.bf16.mxu0 %v1769_v26  ;;  %v397_v41 = vld [vmem:[#allocation2 + $0x30] sm:$0xff]  ;;  %v398_v42 = vld [vmem:[#allocation2 + $0x38] sm:$0xff]  ;;  %v1805_v43 = vpack.c.bf16 %v446_v40, %v445_v37  ;;  %v416_v47 = vld [vmem:[#allocation2 + $0xc8] sm:$0xff] }
  0x4e   : > { %1802 = vmatprep.subr.bf16.mxu1 %v1801_v30  ;;  %v429_v44 = vld [vmem:[#allocation2 + $0x130] sm:$0xff]  ;;  %v430_v45 = vld [vmem:[#allocation2 + $0x138] sm:$0xff]  ;;  %v447_v48 = vld [vmem:[#allocation2 + $0x1c0] sm:$0xff]  ;;  %v1775_v50 = vpack.c.bf16 %v398_v42, %v397_v41  ;;  %v1777_v52 = vpack.c.bf16 %v416_v47, %v415_v46 }
  0x4f   : > { %v448_v49 = vld [vmem:[#allocation2 + $0x1c8] sm:$0xff]  ;;  %v1807_v51 = vpack.c.bf16 %v430_v45, %v429_v44  ;;  %v399_v53 = vld [vmem:[#allocation2 + $0x40] sm:$0xff]  ;;  %v417_v58 = vld [vmem:[#allocation2 + $0xd0] sm:$0xff] }
  0x50   : > { %1772 = vmatpush3.bf16.msra.mxu0 %v1771_v34  ;;  %v400_v54 = vld [vmem:[#allocation2 + $0x48] sm:$0xff]  ;;  %v431_v55 = vld [vmem:[#allocation2 + $0x140] sm:$0xff]  ;;  %v1809_v56 = vpack.c.bf16 %v448_v49, %v447_v48  ;;  %v418_v59 = vld [vmem:[#allocation2 + $0xd8] sm:$0xff] }
  0x51   : > { %1804 = vmatpush3.bf16.msra.mxu1 %v1803_v38  ;;  %1774 = vmatprep.subr.bf16.mxu0 %v1773_v39  ;;  %v432_v57 = vld [vmem:[#allocation2 + $0x148] sm:$0xff]  ;;  %v449_v60 = vld [vmem:[#allocation2 + $0x1d0] sm:$0xff]  ;;  %v450_v61 = vld [vmem:[#allocation2 + $0x1d8] sm:$0xff]  ;;  %v1779_v62 = vpack.c.bf16 %v400_v54, %v399_v53  ;;  %v1781_v0 = vpack.c.bf16 %v418_v59, %v417_v58 }
  0x52   : > { %1806 = vmatprep.subr.bf16.mxu1 %v1805_v43  ;;  %v1811_v63 = vpack.c.bf16 %v432_v57, %v431_v55  ;;  %v401_v1 = vld [vmem:[#allocation2 + $0x50] sm:$0xff]  ;;  %v402_v2 = vld [vmem:[#allocation2 + $0x58] sm:$0xff]  ;;  %v1813_v4 = vpack.c.bf16 %v450_v61, %v449_v60  ;;  %v419_v6 = vld [vmem:[#allocation2 + $0xe0] sm:$0xff]  ;;  %v2082_v60 = vmov 0.0  }
  0x53   : > { %v433_v3 = vld [vmem:[#allocation2 + $0x150] sm:$0xff]  ;;  %v434_v5 = vld [vmem:[#allocation2 + $0x158] sm:$0xff]  ;;  %v420_v7 = vld [vmem:[#allocation2 + $0xe8] sm:$0xff]  ;;  %v1783_v10 = vpack.c.bf16 %v402_v2, %v401_v1 }
  0x54   : > { %1776 = vmatpush3.bf16.msra.mxu0 %v1775_v50  ;;  %v451_v8 = vld [vmem:[#allocation2 + $0x1e0] sm:$0xff]  ;;  %v452_v9 = vld [vmem:[#allocation2 + $0x1e8] sm:$0xff]  ;;  %v1815_v13 = vpack.c.bf16 %v434_v5, %v433_v3  ;;  %v1785_v14 = vpack.c.bf16 %v420_v7, %v419_v6  ;;  %v389_v17 = vld [vmem:[%s2227_s23 + $0x18] sm:$0xff]  ;;  %v2079_v50 = vmov 0.0|0.0  }
  0x55   : > { %1808 = vmatpush3.bf16.msra.mxu1 %v1807_v51  ;;  %1778 = vmatprep.subr.bf16.mxu0 %v1777_v52  ;;  %v403_v11 = vld [vmem:[#allocation2 + $0x60] sm:$0xff]  ;;  %v404_v12 = vld [vmem:[#allocation2 + $0x68] sm:$0xff]  ;;  %v1817_v18 = vpack.c.bf16 %v452_v9, %v451_v8  ;;  %v421_v20 = vld [vmem:[#allocation2 + $0xf0] sm:$0xff] }
  0x56   : > { %1810 = vmatprep.subr.bf16.mxu1 %v1809_v56  ;;  %v435_v15 = vld [vmem:[#allocation2 + $0x160] sm:$0xff]  ;;  %v387_v16 = vld [vmem:[%s2227_s23 + $0x8] sm:$0xff]  ;;  %v422_v21 = vld [vmem:[#allocation2 + $0xf8] sm:$0xff]  ;;  %607 = vmatprep.mubr.f32.mxu1 %v389_v17  ;;  %v1787_v24 = vpack.c.bf16 %v404_v12, %v403_v11 }
  0x57   : > { %v436_v19 = vld [vmem:[#allocation2 + $0x168] sm:$0xff]  ;;  %537 = vmatprep.mubr.f32.mxu0 %v387_v16  ;;  %v453_v22 = vld [vmem:[#allocation2 + $0x1f0] sm:$0xff]  ;;  %v454_v23 = vld [vmem:[#allocation2 + $0x1f8] sm:$0xff]  ;;  %v1789_v26 = vpack.c.bf16 %v422_v21, %v421_v20 }
  0x58   : > { %1780 = vmatpush3.bf16.msra.mxu0 %v1779_v62  ;;  %v1819_v25 = vpack.c.bf16 %v436_v19, %v435_v15  ;;  %v405_v27 = vld [vmem:[#allocation2 + $0x70] sm:$0xff]  ;;  %v406_v28 = vld [vmem:[#allocation2 + $0x78] sm:$0xff]  ;;  %v1821_v30 = vpack.c.bf16 %v454_v23, %v453_v22  ;;  %v737_v32 = vld [vmem:[#allocation4 + $0x180] sm:$0xff] }
  0x59   : > { %1812 = vmatpush3.bf16.msra.mxu1 %v1811_v63  ;;  %1782 = vmatprep.subr.bf16.mxu0 %v1781_v0  ;;  %v437_v29 = vld [vmem:[#allocation2 + $0x170] sm:$0xff]  ;;  %v438_v31 = vld [vmem:[#allocation2 + $0x178] sm:$0xff]  ;;  %v738_v33 = vld [vmem:[#allocation4 + $0x188] sm:$0xff]  ;;  %v1791_v34 = vpack.c.bf16 %v406_v28, %v405_v27 }
  0x5a   : > { %1814 = vmatprep.subr.bf16.mxu1 %v1813_v4  ;;  %v1823_v35 = vpack.c.bf16 %v438_v31, %v437_v29  ;;  %v1864_v36 = vpack.c.bf16 %v738_v33, %v737_v32  ;;  %v721_v37 = vld [vmem:[#allocation4 + $0x100] sm:$0xff]  ;;  %v722_v38 = vld [vmem:[#allocation4 + $0x108] sm:$0xff]  ;;  %v739_v41 = vld [vmem:[#allocation4 + $0x190] sm:$0xff] }
  0x5b   : > { %v455_v39 = vld [vmem:[#allocation2 + $0x200] sm:$0xff]  ;;  %v456_v40 = vld [vmem:[#allocation2 + $0x208] sm:$0xff]  ;;  %v740_v42 = vld [vmem:[#allocation4 + $0x198] sm:$0xff]  ;;  %v1866_v45 = vpack.c.bf16 %v722_v38, %v721_v37 }
  0x5c   : > { %1784 = vmatpush3.bf16.msra.mxu0 %v1783_v10  ;;  %v386_v43 = vld [vmem:[%s2227_s23] sm:$0xff]  ;;  %v388_v44 = vld [vmem:[%s2227_s23 + $0x10] sm:$0xff]  ;;  %v1826_v46 = vpack.c.bf16 %v456_v40, %v455_v39  ;;  %v724_v49 = vld [vmem:[#allocation4 + $0x118] sm:$0xff]  ;;  %v1868_v52 = vpack.c.bf16 %v740_v42, %v739_v41 }
  0x5d   : > { %1816 = vmatpush3.bf16.msra.mxu1 %v1815_v13  ;;  %1786 = vmatprep.subr.bf16.mxu0 %v1785_v14  ;;  %v457_v47 = vld [vmem:[#allocation2 + $0x210] sm:$0xff]  ;;  %v458_v51 = vld [vmem:[#allocation2 + $0x218] sm:$0xf]  ;;  %v741_v53 = vld [vmem:[#allocation4 + $0x1a0] sm:$0xff] }
  0x5e   : > { %1818 = vmatprep.subr.bf16.mxu1 %v1817_v18  ;;  %v723_v48 = vld [vmem:[#allocation4 + $0x110] sm:$0xff]  ;;  %v742_v54 = vld [vmem:[#allocation4 + $0x1a8] sm:$0xff]  ;;  %v705_v55 = vld [vmem:[#allocation4 + $0x80] sm:$0xff]  ;;  %v1829_v59 = vpack.c.bf16 %v458_v51, %v457_v47 }
  0x5f   : > { %v706_v56 = vld [vmem:[#allocation4 + $0x88] sm:$0xff]  ;;  %vm2235_vm2 = vmpackc.low %vm469_vm0, %vm2080_vm1  ;;  %v1870_v58 = vpack.c.bf16 %v724_v49, %v723_v48  ;;  %v689_v61 = vld [vmem:[#allocation4] sm:$0xff]  ;;  %v1872_v62 = vpack.c.bf16 %v742_v54, %v741_v53 }
  0x60   : > { %1788 = vmatpush3.bf16.msra.mxu0 %v1787_v24  ;;  %v725_v63 = vld [vmem:[#allocation4 + $0x120] sm:$0xff]  ;;  %v726_v0 = vld [vmem:[#allocation4 + $0x128] sm:$0xff]  ;;  %v1832_v1 = vpack.c.bf16 %v706_v56, %v705_v55  ;;  %v743_v3 = vld [vmem:[#allocation4 + $0x1b0] sm:$0xff] }
  0x61   : > { %1820 = vmatpush3.bf16.msra.mxu1 %v1819_v25  ;;  %1790 = vmatprep.subr.bf16.mxu0 %v1789_v26  ;;  %v690_v2 = vld [vmem:[#allocation4 + $0x8] sm:$0xff]  ;;  %v744_v4 = vld [vmem:[#allocation4 + $0x1b8] sm:$0xff]  ;;  %v707_v5 = vld [vmem:[#allocation4 + $0x90] sm:$0xff]  ;;  %v1874_v8 = vpack.c.bf16 %v726_v0, %v725_v63 }
  0x62   : > { %1822 = vmatprep.subr.bf16.mxu1 %v1821_v30  ;;  %v708_v6 = vld [vmem:[#allocation4 + $0x98] sm:$0xff]  ;;  %v390_v7 = vld [vmem:[%s2227_s23 + $0x20] sm:$0xff]  ;;  %v1834_v9 = vpack.c.bf16 %v690_v2, %v689_v61  ;;  %v691_v10 = vld [vmem:[#allocation4 + $0x10] sm:$0xff]  ;;  %v1876_v11 = vpack.c.bf16 %v744_v4, %v743_v3 }
  0x63   : > { %v727_v12 = vld [vmem:[#allocation4 + $0x130] sm:$0xff]  ;;  %v728_v13 = vld [vmem:[#allocation4 + $0x138] sm:$0xff]  ;;  %v1836_v14 = vpack.c.bf16 %v708_v6, %v707_v5  ;;  %v745_v16 = vld [vmem:[#allocation4 + $0x1c0] sm:$0xff] }
  0x64   : > { %1792 = vmatpush3.bf16.msra.mxu0 %v1791_v34  ;;  %v692_v15 = vld [vmem:[#allocation4 + $0x18] sm:$0xff]  ;;  %v746_v17 = vld [vmem:[#allocation4 + $0x1c8] sm:$0xff]  ;;  %v709_v18 = vld [vmem:[#allocation4 + $0xa0] sm:$0xff]  ;;  %v1878_v22 = vpack.c.bf16 %v728_v13, %v727_v12 }
  0x65   : > { %1824 = vmatpush3.bf16.msra.mxu1 %v1823_v35  ;;  %1865 = vmatprep.subr.bf16.mxu0 %v1864_v36  ;;  %v710_v19 = vld [vmem:[#allocation4 + $0xa8] sm:$0xff]  ;;  %v693_v20 = vld [vmem:[#allocation4 + $0x20] sm:$0xff]  ;;  %v1838_v23 = vpack.c.bf16 %v692_v15, %v691_v10  ;;  %v1880_v24 = vpack.c.bf16 %v746_v17, %v745_v16  ;;  %v747_v29 = vld [vmem:[#allocation4 + $0x1d0] sm:$0xff] }
  0x66   : > { %1825 = vmatprep.subr.bf16.mxu1 %v2079_v50  ;;  %v694_v21 = vld [vmem:[#allocation4 + $0x28] sm:$0xff]  ;;  %v729_v25 = vld [vmem:[#allocation4 + $0x140] sm:$0xff]  ;;  %v1840_v28 = vpack.c.bf16 %v710_v19, %v709_v18  ;;  %v748_v30 = vld [vmem:[#allocation4 + $0x1d8] sm:$0xff] }
  0x67   : > { %538 = vmatmul.mubr.f32.vlgmr.msra.gmra.mrb[0].mxu0 %v386_v43  ;;  %v730_v26 = vld [vmem:[#allocation4 + $0x148] sm:$0xff]  ;;  %v687_v31 = vld [vmem:[%s2250_s26 + $0x18] sm:$0xff]  ;;  %v711_v32 = vld [vmem:[#allocation4 + $0xb0] sm:$0xff]  ;;  %v1842_v35 = vpack.c.bf16 %v694_v21, %v693_v20  ;;  %v1884_v37 = vpack.c.bf16 %v748_v30, %v747_v29 }
  0x68   : > { %608 = vmatmul.mubr.f32.vlgmr.msra.gmra.mrb[0].mxu1 %v388_v44  ;;  %1867 = vmatpush3.bf16.msra.mxu0 %v1866_v45  ;;  %v685_v27 = vld [vmem:[%s2250_s26 + $0x8] sm:$0xff]  ;;  %v712_v33 = vld [vmem:[#allocation4 + $0xb8] sm:$0xff]  ;;  %v1882_v34 = vpack.c.bf16 %v730_v26, %v729_v25  ;;  %v695_v36 = vld [vmem:[#allocation4 + $0x30] sm:$0xff] }
  0x69   : > { %1827 = vmatpush3.bf16.msra.mxu1 %v1826_v46  ;;  %1653 = vmatprep.mubr.msk.f32.mxu1 %vm2081_vm3, %v2082_v60  ;;  %v731_v38 = vld [vmem:[#allocation4 + $0x150] sm:$0xff]  ;;  %v732_v39 = vld [vmem:[#allocation4 + $0x158] sm:$0xff]  ;;  %v1844_v40 = vpack.c.bf16 %v712_v33, %v711_v32  ;;  %v749_v42 = vld [vmem:[#allocation4 + $0x1e0] sm:$0xff] }
  0x6a   : > { %1828 = vmatprep.subr.bf16.mxu1 %v2079_v50  ;;  %1869 = vmatprep.subr.bf16.mxu0 %v1868_v52  ;;  %v696_v41 = vld [vmem:[#allocation4 + $0x38] sm:$0xff]  ;;  %v750_v43 = vld [vmem:[#allocation4 + $0x1e8] sm:$0xff]  ;;  %v713_v44 = vld [vmem:[#allocation4 + $0xc0] sm:$0xff]  ;;  %v1886_v46 = vpack.c.bf16 %v732_v39, %v731_v38 }
  0x6b   : > { %903 = vmatprep.mubr.f32.mxu0 %v687_v31  ;;  %v714_v45 = vld [vmem:[#allocation4 + $0xc8] sm:$0xff]  ;;  %v1846_v47 = vpack.c.bf16 %v696_v41, %v695_v36  ;;  %v697_v48 = vld [vmem:[#allocation4 + $0x40] sm:$0xff]  ;;  %v1888_v49 = vpack.c.bf16 %v750_v43, %v749_v42  ;;  %v751_v55 = vld [vmem:[#allocation4 + $0x1f0] sm:$0xff] }
  0x6c   : > { %1871 = vmatpush3.bf16.msra.mxu0 %v1870_v58  ;;  %v733_v51 = vld [vmem:[#allocation4 + $0x160] sm:$0xff]  ;;  %v734_v52 = vld [vmem:[#allocation4 + $0x168] sm:$0xff]  ;;  %v1848_v53 = vpack.c.bf16 %v714_v45, %v713_v44  ;;  %v752_v56 = vld [vmem:[#allocation4 + $0x1f8] sm:$0xff] }
  0x6d   : > { %1831 = vmatpush3.bf16.msk.msra.mxu1 %vm2235_vm2, %v1829_v59  ;;  %1873 = vmatprep.subr.bf16.mxu0 %v1872_v62  ;;  %v698_v54 = vld [vmem:[#allocation4 + $0x48] sm:$0xff]  ;;  %v715_v58 = vld [vmem:[#allocation4 + $0xd0] sm:$0xff]  ;;  %v716_v59 = vld [vmem:[#allocation4 + $0xd8] sm:$0xff]  ;;  %v1890_v61 = vpack.c.bf16 %v734_v52, %v733_v51  ;;  %v1892_v63 = vpack.c.bf16 %v752_v56, %v751_v55 }
  0x6e   : > { %1833 = vmatprep.subr.bf16.mxu1 %v1832_v1  ;;  %v1850_v62 = vpack.c.bf16 %v698_v54, %v697_v48  ;;  %v735_v0 = vld [vmem:[#allocation4 + $0x170] sm:$0xff]  ;;  %v736_v1 = vld [vmem:[#allocation4 + $0x178] sm:$0xff]  ;;  %v1852_v2 = vpack.c.bf16 %v716_v59, %v715_v58  ;;  %v717_v5 = vld [vmem:[#allocation4 + $0xe0] sm:$0xff] }
  0x6f   : > { %v699_v3 = vld [vmem:[#allocation4 + $0x50] sm:$0xff]  ;;  %v700_v4 = vld [vmem:[#allocation4 + $0x58] sm:$0xff]  ;;  %v718_v6 = vld [vmem:[#allocation4 + $0xe8] sm:$0xff] }
  0x70   : > { %1654 = vmatmul.mubr.msk.f32.vlgmr.msra.gmra.mrb[2].mxu1 %vm465_vm4, %v390_v7  ;;  %1875 = vmatpush3.bf16.msra.mxu0 %v1874_v8  ;;  %v1894_v7 = vpack.c.bf16 %v736_v1, %v735_v0  ;;  %v1854_v8 = vpack.c.bf16 %v700_v4, %v699_v3  ;;  %v701_v10 = vld [vmem:[#allocation4 + $0x60] sm:$0xff]  ;;  %v719_v12 = vld [vmem:[#allocation4 + $0xf0] sm:$0xff]  ;;  %v720_v13 = vld [vmem:[#allocation4 + $0xf8] sm:$0xff] }
  0x71   : > { %1835 = vmatpush3.bf16.msra.mxu1 %v1834_v9  ;;  %1877 = vmatprep.subr.bf16.mxu0 %v1876_v11  ;;  %v1856_v9 = vpack.c.bf16 %v718_v6, %v717_v5  ;;  %v702_v11 = vld [vmem:[#allocation4 + $0x68] sm:$0xff]  ;;  %v1860_v16 = vpack.c.bf16 %v720_v13, %v719_v12  ;;  %v703_v17 = vld [vmem:[#allocation4 + $0x70] sm:$0xff]  ;;  %v704_v18 = vld [vmem:[#allocation4 + $0x78] sm:$0xff] }
  0x72   : > { %1837 = vmatprep.subr.bf16.mxu1 %v1836_v14  ;;  %833 = vmatprep.mubr.f32.mxu1 %v685_v27  ;;  %v686_v14 = vld [vmem:[%s2250_s26 + $0x10] sm:$0xff]  ;;  %v1858_v15 = vpack.c.bf16 %v702_v11, %v701_v10  ;;  %v1862_v19 = vpack.c.bf16 %v704_v18, %v703_v17  ;;  %v753_v20 = vld [vmem:[#allocation4 + $0x200] sm:$0xff]  ;;  %v754_v21 = vld [vmem:[#allocation4 + $0x208] sm:$0xff] }
  0x73   : > { %v756_v25 = vld [vmem:[#allocation4 + $0x218] sm:$0xf]  ;;  %v980_v27 = vld [vmem:[%s2443_s4] sm:$0xff]  ;;  %v982_v31 = vld [vmem:[%s2443_s4 + $0x10] sm:$0xff] }
  0x74   : > { %1879 = vmatpush3.bf16.msra.mxu0 %v1878_v22  ;;  %v684_v22 = vld [vmem:[%s2250_s26] sm:$0xff]  ;;  %v983_v32 = vld [vmem:[%s2443_s4 + $0x18] sm:$0xff]  ;;  %v986_v36 = vld [vmem:[%s2443_s4 + $0x30] sm:$0xff] }
  0x75   : > { %1839 = vmatpush3.bf16.msra.mxu1 %v1838_v23  ;;  %1881 = vmatprep.subr.bf16.mxu0 %v1880_v24  ;;  %v1897_v23 = vpack.c.bf16 %v754_v21, %v753_v20  ;;  %v755_v24 = vld [vmem:[#allocation4 + $0x210] sm:$0xff]  ;;  %v688_v29 = vld [vmem:[%s2250_s26 + $0x20] sm:$0xff]  ;;  %v1931_v33 = vpack.c.bf16 %v983_v32, %v982_v31  ;;  %v991_v43 = vld [vmem:[%s2443_s4 + $0x58] sm:$0xff] }
  0x76   : > { %1841 = vmatprep.subr.bf16.mxu1 %v1840_v28  ;;  %v1900_v26 = vpack.c.bf16 %v756_v25, %v755_v24  ;;  %v981_v28 = vld [vmem:[%s2443_s4 + $0x8] sm:$0xff]  ;;  %v984_v57 = vld [vmem:[%s2443_s4 + $0x20] sm:$0xff]  ;;  %v990_v42 = vld [vmem:[%s2443_s4 + $0x50] sm:$0xff] }
  0x77   : > { %v1928_v30 = vpack.c.bf16 %v981_v28, %v980_v27  ;;  %v988_v39 = vld [vmem:[%s2443_s4 + $0x40] sm:$0xff]  ;;  %v1943_v44 = vpack.c.bf16 %v991_v43, %v990_v42  ;;  %v994_v48 = vld [vmem:[%s2443_s4 + $0x70] sm:$0xff]  ;;  %v999_v56 = vld [vmem:[%s2444_s5 + $0x18] sm:$0xff] }
  0x78   : > { %1883 = vmatpush3.bf16.msra.mxu0 %v1882_v34  ;;  %v985_v34 = vld [vmem:[%s2443_s4 + $0x28] sm:$0xff]  ;;  %v992_v45 = vld [vmem:[%s2443_s4 + $0x60] sm:$0xff]  ;;  %v998_v54 = vld [vmem:[%s2444_s5 + $0x10] sm:$0xff] }
  0x79   : > { %1843 = vmatpush3.bf16.msra.mxu1 %v1842_v35  ;;  %1885 = vmatprep.subr.bf16.mxu0 %v1884_v37  ;;  %v1934_v35 = vpack.c.bf16 %v985_v34, %v984_v57  ;;  %v987_v37 = vld [vmem:[%s2443_s4 + $0x38] sm:$0xff]  ;;  %v996_v52 = vld [vmem:[%s2444_s5] sm:$0xff]  ;;  %v1907_v58 = vpack.c.bf16 %v999_v56, %v998_v54  ;;  %v1005_v3 = vld [vmem:[%s2444_s5 + $0x48] sm:$0xff] }
  0x7a   : > { %1845 = vmatprep.subr.bf16.mxu1 %v1844_v40  ;;  %v1937_v38 = vpack.c.bf16 %v987_v37, %v986_v36  ;;  %v989_v40 = vld [vmem:[%s2443_s4 + $0x48] sm:$0xff]  ;;  %v1000_v59 = vld [vmem:[%s2444_s5 + $0x20] sm:$0xff]  ;;  %v1003_v0 = vld [vmem:[%s2444_s5 + $0x38] sm:$0xff] }
  0x7b   : > { %v1940_v41 = vpack.c.bf16 %v989_v40, %v988_v39  ;;  %v1006_v5 = vld [vmem:[%s2444_s5 + $0x50] sm:$0xff]  ;;  %v1007_v6 = vld [vmem:[%s2444_s5 + $0x58] sm:$0xff]  ;;  %v1439_v31 = vld [vmem:[%s2447_s8 + $0x1] ss:$0 sm:$0xff] }
  0x7c   : > { %1887 = vmatpush3.bf16.msra.mxu0 %v1886_v46  ;;  %v993_v46 = vld [vmem:[%s2443_s4 + $0x68] sm:$0xff]  ;;  %v1010_v11 = vld [vmem:[%s2444_s5 + $0x70] sm:$0xff]  ;;  %v1011_v12 = vld [vmem:[%s2444_s5 + $0x78] sm:$0xff] }
  0x7d   : > { %1847 = vmatpush3.bf16.msra.mxu1 %v1846_v47  ;;  %1889 = vmatprep.subr.bf16.mxu0 %v1888_v49  ;;  %v1946_v47 = vpack.c.bf16 %v993_v46, %v992_v45  ;;  %v995_v49 = vld [vmem:[%s2443_s4 + $0x78] sm:$0xff]  ;;  %v1925_v13 = vpack.c.bf16 %v1011_v12, %v1010_v11  ;;  %v1160_v39 = vld [vmem:[%s2445_s6] sm:$0xff]  ;;  %v1161_v40 = vld [vmem:[%s2445_s6 + $0x8] sm:$0xff] }
  0x7e   : > { %1849 = vmatprep.subr.bf16.mxu1 %v1848_v53  ;;  %v1949_v51 = vpack.c.bf16 %v995_v49, %v994_v48  ;;  %v997_v53 = vld [vmem:[%s2444_s5 + $0x8] sm:$0xff]  ;;  %v1952_v42 = vpack.c.bf16 %v1161_v40, %v1160_v39  ;;  %v1163_v43 = vld [vmem:[%s2445_s6 + $0x18] sm:$0xff] }
  0x7f   : > { %v1904_v55 = vpack.c.bf16 %v997_v53, %v996_v52  ;;  %v1165_v45 = vld [vmem:[%s2445_s6 + $0x28] sm:$0xff]  ;;  %v1167_v48 = vld [vmem:[%s2445_s6 + $0x38] sm:$0xff]  ;;  %v1442_v53 = vld [vmem:[%s2447_s8 + $0x2] ss:$0 sm:$0xff] }
  0x80   : > { %1891 = vmatpush3.bf16.msra.mxu0 %v1890_v61  ;;  %v1001_v61 = vld [vmem:[%s2444_s5 + $0x28] sm:$0xff] }
  0x81   : > { %1851 = vmatpush3.bf16.msra.mxu1 %v1850_v62  ;;  %1893 = vmatprep.subr.bf16.mxu0 %v1892_v63  ;;  %v1910_v62 = vpack.c.bf16 %v1001_v61, %v1000_v59  ;;  %v1002_v63 = vld [vmem:[%s2444_s5 + $0x30] sm:$0xff]  ;;  %v1249_v59 = vld [vmem:[%s2446_s7] sm:$0xff] }
  0x82   : > { %1853 = vmatprep.subr.bf16.mxu1 %v1852_v2  ;;  %v1913_v1 = vpack.c.bf16 %v1003_v0, %v1002_v63  ;;  %v1004_v2 = vld [vmem:[%s2444_s5 + $0x40] sm:$0xff] }
  0x83   : > { %v1916_v4 = vpack.c.bf16 %v1005_v3, %v1004_v2  ;;  %v1443_v61 = vld [vmem:[%s2447_s8 + $0x3] ss:$0 sm:$0xff]  ;;  %v1445_v2 = vld [vmem:[%s2447_s8 + $0x4] ss:$0 sm:$0xff] }
  0x84   : > { %1895 = vmatpush3.bf16.msra.mxu0 %v1894_v7  ;;  %v1919_v7 = vpack.c.bf16 %v1007_v6, %v1006_v5 }
  0x85   : > { %1855 = vmatpush3.bf16.msra.mxu1 %v1854_v8  ;;  %1903 = vmatprep.subr.bf16.mxu0 %v2079_v50  ;;  %v1008_v8 = vld [vmem:[%s2444_s5 + $0x60] sm:$0xff] }
  0x86   : > { %1857 = vmatprep.subr.bf16.mxu1 %v1856_v9  ;;  %v1009_v9 = vld [vmem:[%s2444_s5 + $0x68] sm:$0xff] }
  0x87   : > { %904 = vmatmul.mubr.f32.vlgmr.msra.gmra.mrb[2].mxu0 %v686_v14  ;;  %v1922_v10 = vpack.c.bf16 %v1009_v9, %v1008_v8 }
  0x88   : > { %1699 = vmatprep.mubr.msk.f32.mxu0 %vm2081_vm3, %v2082_v60  ;;  %1905 = vmatpush3.bf16.msra.mxu0 %v1904_v55 }
  0x89   : > { %1859 = vmatpush3.bf16.msra.mxu1 %v1858_v15  ;;  %1906 = vmatprep.subr.bf16.mxu0 %v2079_v50 }
  0x8a   : > { %1861 = vmatprep.subr.bf16.mxu1 %v1860_v16  ;;  %v1436_v16 = vld [vmem:[%s2447_s8] ss:$0 sm:$0xff] }
  0x8c   : > { %1908 = vmatpush3.bf16.msra.mxu0 %v1907_v58 }
  0x8d   : > { %1863 = vmatpush3.bf16.msra.mxu1 %v1862_v19  ;;  %1909 = vmatprep.subr.bf16.mxu0 %v2079_v50 }
  0x8e   : > { %1896 = vmatprep.subr.bf16.mxu1 %v2079_v50 }
  0x90   : > { %834 = vmatmul.mubr.f32.vlgmr.msra.gmra.mrb[4].mxu1 %v684_v22  ;;  %1911 = vmatpush3.bf16.msra.mxu0 %v1910_v62 }
  0x91   : > { %1898 = vmatpush3.bf16.msra.mxu1 %v1897_v23  ;;  %1664 = vmatprep.mubr.msk.f32.mxu1 %vm2081_vm3, %v2082_v60 }
  0x92   : > { %1899 = vmatprep.subr.bf16.mxu1 %v2079_v50  ;;  %1912 = vmatprep.subr.bf16.mxu0 %v2079_v50 }
  0x94   : > { %1914 = vmatpush3.bf16.msra.mxu0 %v1913_v1 }
  0x95   : > { %1902 = vmatpush3.bf16.msk.msra.mxu1 %vm2235_vm2, %v1900_v26  ;;  %1915 = vmatprep.subr.bf16.mxu0 %v2079_v50 }
  0x96   : > { %1927 = vmatprep.subr.bf16.mxu1 %v2079_v50 }
  0x98   : > { %1665 = vmatmul.mubr.msk.f32.vlgmr.msra.gmra.mrb[6].mxu1 %vm465_vm4, %v688_v29  ;;  %1917 = vmatpush3.bf16.msra.mxu0 %v1916_v4 }
  0x99   : > { %1929 = vmatpush3.bf16.msra.mxu1 %v1928_v30  ;;  %1734 = vmatprep.mubr.msk.f32.mxu1 %vm2081_vm3, %v2082_v60 }
  0x9a   : > { %1930 = vmatprep.subr.bf16.mxu1 %v2079_v50  ;;  %1918 = vmatprep.subr.bf16.mxu0 %v2079_v50 }
  0x9c   : > { %1920 = vmatpush3.bf16.msra.mxu0 %v1919_v7 }
  0x9d   : > { %1932 = vmatpush3.bf16.msra.mxu1 %v1931_v33  ;;  %1921 = vmatprep.subr.bf16.mxu0 %v2079_v50 }
  0x9e   : > { %1933 = vmatprep.subr.bf16.mxu1 %v2079_v50 }
  0xa0   : > { %1923 = vmatpush3.bf16.msra.mxu0 %v1922_v10 }
  0xa1   : > { %1935 = vmatpush3.bf16.msra.mxu1 %v1934_v35  ;;  %1924 = vmatprep.subr.bf16.mxu0 %v2079_v50 }
  0xa2   : > { %1936 = vmatprep.subr.bf16.mxu1 %v2079_v50 }
  0xa4   : > { %1926 = vmatpush3.bf16.msra.mxu0 %v1925_v13 }
  0xa5   : > { %1938 = vmatpush3.bf16.msra.mxu1 %v1937_v38  ;;  %1951 = vmatprep.subr.bf16.mxu0 %v2079_v50 }
  0xa6   : > { %1939 = vmatprep.subr.bf16.mxu1 %v2079_v50 }
  0xa9   : > { %1941 = vmatpush3.bf16.msra.mxu1 %v1940_v41  ;;  %v1162_v41 = vld [vmem:[%s2445_s6 + $0x10] sm:$0xff] }
  0xaa   : > { %1942 = vmatprep.subr.bf16.mxu1 %v2079_v50 }
  0xad   : > { %1944 = vmatpush3.bf16.msra.mxu1 %v1943_v44  ;;  %v1955_v44 = vpack.c.bf16 %v1163_v43, %v1162_v41 }
  0xae   : > { %1945 = vmatprep.subr.bf16.mxu1 %v2079_v50 }
  0xb1   : > { %1947 = vmatpush3.bf16.msra.mxu1 %v1946_v47  ;;  %v1166_v47 = vld [vmem:[%s2445_s6 + $0x30] sm:$0xff] }
  0xb2   : > { %1948 = vmatprep.subr.bf16.mxu1 %v2079_v50  ;;  %v1961_v49 = vpack.c.bf16 %v1167_v48, %v1166_v47 }
  0xb5   : > { %1950 = vmatpush3.bf16.msra.mxu1 %v1949_v51 }
  0xb6   : > { %1756 = vmatprep.subr.mxu1 %v2082_v60 }
 0x13a   : > { %v1482_v14 = vpop.f32.mrb[0].mxu0 }
 0x13b   : > { %v1517_v15 = vpop.f32.mrb[0].mxu1  ;;  %v1483_v17 = vpop.f32.mrb[1].mxu0 }
 0x13c   : > { %v1484_v18 = vadd.f32 %v1483_v17, %v1482_v14  ;;  %v1518_v19 = vpop.f32.mrb[1].mxu1 }
 0x13d   : > { %v1519_v20 = vadd.f32 %v1518_v19, %v1517_v15 }
 0x13e   : > { %v540_v21 = vadd.f32 %v1484_v18, %v1436_v16 }
 0x140   : > { %v610_v22 = vadd.f32 %v1519_v20, %v540_v21 }
 0x143   : > { %v679_v23 = vpop.f32.mrb[2].mxu1 }
 0x144   : > { %v680_v24 = vadd.f32 %v679_v23, %v610_v22  ;;  %v1655_v25 = vpop.f32.mrb[3].mxu1 }
 0x146   : > { %v683_v26 = vmax.f32 %v680_v24, 0.0 }
 0x148   : > { %1735 = vmatmul.mubr.f32.vlgmr.msra.gmra.mrb[8].mxu1 %v683_v26 }
 0x149   : > { %1758 = vmatprep.mubr.msk.f32.mxu1 %vm2081_vm3, %v2082_v60  ;;  %1757 = vmatpush3.msra.mxu1 %v1249_v59 }
 0x15a   : > { %v1592_v27 = vpop.f32.mrb[2].mxu0 }
 0x15b   : > { %v1593_v28 = vpop.f32.mrb[3].mxu0 }
 0x15c   : > { %v1594_v29 = vadd.f32 %v1593_v28, %v1592_v27 }
 0x163   : > { %v1557_v30 = vpop.f32.mrb[4].mxu1 }
 0x164   : > { %v1558_v32 = vpop.f32.mrb[5].mxu1 }
 0x165   : > { %v1559_v33 = vadd.f32 %v1558_v32, %v1557_v30 }
 0x167   : > { %v836_v57 = vadd.f32 %v1559_v33, %v1439_v31 }
 0x169   : > { %v906_v34 = vadd.f32 %v1594_v29, %v836_v57 }
 0x16b   : > { %v975_v35 = vpop.f32.mrb[6].mxu1 }
 0x16c   : > { %v976_v36 = vadd.f32 %v975_v35, %v906_v34  ;;  %v1666_v37 = vpop.f32.mrb[7].mxu1 }
 0x16e   : > { %v979_v38 = vmax.f32 %v976_v36, 0.0 }
 0x170   : > { %1700 = vmatmul.mubr.f32.vlgmr.msra.gmra.mrb[4].mxu0 %v979_v38 }
 0x171   : > { %1753 = vmatprep.mubr.msk.f32.mxu0 %vm2081_vm3, %v2082_v60  ;;  %1953 = vmatpush3.bf16.msra.mxu0 %v1952_v42  ;;  %v1164_v60 = vld [vmem:[%s2445_s6 + $0x20] sm:$0xff] }
 0x172   : > { %1954 = vmatprep.subr.bf16.mxu0 %v2079_v50  ;;  %v1958_v46 = vpack.c.bf16 %v1165_v45, %v1164_v60 }
 0x175   : > { %1956 = vmatpush3.bf16.msra.mxu0 %v1955_v44 }
 0x176   : > { %1957 = vmatprep.subr.bf16.mxu0 %v2079_v50 }
 0x179   : > { %1959 = vmatpush3.bf16.msra.mxu0 %v1958_v46 }
 0x17a   : > { %1960 = vmatprep.subr.bf16.mxu0 %v2079_v50 }
 0x17d   : > { %1962 = vmatpush3.bf16.msra.mxu0 %v1961_v49 }
 0x21b   : > { %v1148_v51 = vpop.f32.mrb[8].mxu1 }
 0x21c   : > { %v1736_v52 = vpop.f32.mrb[9].mxu1 }
 0x243   : > { %v1078_v54 = vpop.f32.mrb[4].mxu0 }
 0x244   : > { %v1149_v55 = vadd.f32 %v1148_v51, %v1078_v54  ;;  %v1701_v56 = vpop.f32.mrb[5].mxu0 }
 0x246   : > { %v1158_v50 = vadd.f32 %v1442_v53, %v1149_v55 }
 0x248   : > { %v1159_v58 = vmax.f32 %v1158_v50, 0.0 }
 0x24a   : > { %1754 = vmatmul.mubr.msk.f32.vlgmr.msra.gmra.mrb[6].mxu0 %vm1174_vm5, %v1159_v58 }
 0x31d   : > { %v1244_v62 = vpop.f32.mrb[6].mxu0 }
 0x31e   : > { %v1245_v63 = vadd.f32 %v1443_v61, %v1244_v62  ;;  %v1755_v0 = vpop.f32.mrb[7].mxu0 }
 0x320   : > { %v1248_v1 = vmax.f32 %v1245_v63, 0.0 }
 0x322   : > { %1759 = vmatmul.mubr.msk.f32.vlgmr.msra.gmra.mrb[10].mxu1 %vm1256_vm6, %v1248_v1 }
 0x3f5   : > { %v1326_v3 = vpop.f32.mrb[10].mxu1 }
 0x3f6   : > { %v1327_v4 = vadd.f32 %v1445_v2, %v1326_v3  ;;  %v1760_v5 = vpop.f32.mrb[11].mxu1 }
 0x3f8   : > { %v1447_v6 = vmul.f32 -1.442695, %v1327_v4 }
 0x3fa   : > { %1999 = vpow2.f32 %v1447_v6 }
 0x404   : > { %v2000_v7 = vpop.eup %1999 }
 0x405   : > { %v1333_v8 = vadd.f32 1.0, %v2000_v7 }
 0x407   : > { %2001 = vrcp.f32 %v1333_v8 }
 0x411   : > { %v2002_v9 = vpop.eup %2001 }
 0x412   : > { %1336 = vst [vmem:[%s380_s27] sm:$0xff] %v2002_v9 }
 0x413 PF: > { %s21_s30 = sadd.s32 1, %s2073_s30  }
 0x414   : > { %p18_p9 = scmp.ge.s32.totalorder %s21_s30, 4  }
 0x416   :  { %20 = sbr.rel (!%p18_p9) target bundleno = 2 (0x2), region = 98 }
 0x41d   :  { %1356 = vsyncpa [#allocation3], 1 }
 0x41e   :  { %1358 = vsyncpa [#allocation3 + $0x1], 1 }
 0x41f   :  { %1359 = vsyncpa [#allocation5], 1 }

</bundles_post_ra>
